<compile_context>
chip_gen: v6e
topology: v6e:2x2x1
jax: 0.10.0
libtpu: 0.0.40
codegen_flags: <defaults>
</compile_context>

<pallas_src>
from functools import partial

import jax
import jax.numpy as jnp
from jax.experimental import pallas as pl
from jax.experimental.pallas import tpu as pltpu

EPS = 1e-5


def _basic_block_kernel(x_ref, w1_ref, w2_ref, sb1_ref, sb2_ref, mask_ref, out_ref, *,
                        width):
    # x_ref    : (N, C, HW)   input (channels in sublanes, flattened spatial in lanes)
    # w1_ref   : (C, 9*C)     conv1 weights, column index = (kh*3+kw)*C + ci
    # w2_ref   : (C, 9*C)     conv2 weights
    # sb1_ref  : (C, 2)       folded BN1: col0 = scale, col1 = bias
    # sb2_ref  : (C, 2)       folded BN2
    # mask_ref : (9, HW)      f32 0/1 tap-validity masks (emulate the padding=1 zero border)
    # out_ref  : (N, C, HW)   output (lane-dense, HW = multiple of 128)
    n_img, _, hw = x_ref.shape

    # Hoisted loads (weights / BN params / masks are reused for every image).
    w1 = w1_ref[...]
    w2 = w2_ref[...]
    s1, b1 = sb1_ref[:, 0:1], sb1_ref[:, 1:2]          # (C, 1), broadcast over lanes
    s2, b2 = sb2_ref[:, 0:1], sb2_ref[:, 1:2]
    masks = [mask_ref[t:t + 1, :] for t in range(9)]   # each (1, HW)

    def conv3x3(img, w_mat):
        # img (C, HW).  Tap (kh, kw) of output pixel q = h*W + w needs img[:, q + dh*W + dw]
        # (dh = kh-1, dw = kw-1) when (h+dh, w+dw) is in-bounds, else 0.  A circular lane
        # roll by -(dh*W+dw) followed by the 0/1 border mask produces exactly that (every
        # wrap-around position is an out-of-bounds position and is masked to zero).
        parts = []
        for kh in range(3):
            for kw in range(3):
                delta = (kh - 1) * width + (kw - 1)
                if delta == 0:
                    shifted = img
                else:
                    shifted = pltpu.roll(img, shift=(-delta) % hw, axis=1)
                parts.append(shifted * masks[kh * 3 + kw])
        cols = jnp.concatenate(parts, axis=0)                              # (9*C, HW)
        return jnp.dot(w_mat, cols, preferred_element_type=jnp.float32)   # (C, HW)

    # Whole batch in this single grid step (static unroll; N is tiny).
    for n in range(n_img):
        x_img = x_ref[n]                                                   # (C, HW)
        # conv1 + BN1 + ReLU (intermediate never leaves vregs/VMEM)
        h = jnp.maximum(conv3x3(x_img, w1) * s1 + b1, 0.0)
        # conv2 + BN2 + residual add (this BasicBlock has NO post-add ReLU)
        y = conv3x3(h, w2) * s2 + b2 + x_img
        out_ref[n] = y.astype(out_ref.dtype)


def _fold_bn(gamma, beta, mean, var, eps=EPS):
    scale = gamma / jnp.sqrt(var + eps)
    bias = beta - mean * scale
    return jnp.stack([scale, bias], axis=1).astype(jnp.float32)            # (C, 2)


def basic_block_forward(x_nchw, params):
    """BasicBlock.forward (stride=1, downsample=None): conv2+bn2(relu(bn1(conv1(x)))) + x."""
    N, C, H, W = x_nchw.shape
    HW = H * W

    # NCHW flattened over (H, W) is already the kernel's (N, C, HW) layout: reshape only.
    x_flat = x_nchw.reshape(N, C, HW).astype(jnp.float32)

    def fold_w(w_hwio):
        # HWIO (kh, kw, ci, co) -> (co, (kh*3+kw)*C + ci), matching the im2col row order.
        return jnp.transpose(w_hwio.astype(jnp.float32), (3, 0, 1, 2)).reshape(C, 9 * C)

    w1 = fold_w(params["w1"])
    w2 = fold_w(params["w2"])
    sb1 = _fold_bn(params["gamma1"], params["beta1"], params["mean1"], params["var1"])
    sb2 = _fold_bn(params["gamma2"], params["beta2"], params["mean2"], params["var2"])

    # Tap-validity masks: tap (kh, kw) is valid at pixel (h, w) iff (h+kh-1, w+kw-1) lies
    # inside the image (this is exactly the padding=1 zero border of the conv).
    hh, ww = jnp.meshgrid(jnp.arange(H), jnp.arange(W), indexing="ij")
    hh = hh.reshape(1, HW)
    ww = ww.reshape(1, HW)
    mask_rows = []
    for kh in range(3):
        for kw in range(3):
            dh, dw = kh - 1, kw - 1
            valid = (hh + dh >= 0) & (hh + dh < H) & (ww + dw >= 0) & (ww + dw < W)
            mask_rows.append(valid)
    masks = jnp.concatenate(mask_rows, axis=0).astype(jnp.float32)         # (9, HW)

    out = pl.pallas_call(
        partial(_basic_block_kernel, width=W),
        out_shape=jax.ShapeDtypeStruct((N, C, HW), jnp.float32),
        grid_spec=pltpu.PrefetchScalarGridSpec(
            num_scalar_prefetch=0,
            grid=(1,),  # whole (tiny) problem in one step; see ResNet-scale TODO above
            in_specs=[
                pl.BlockSpec((N, C, HW), lambda i: (0, 0, 0)),
                pl.BlockSpec((C, 9 * C), lambda i: (0, 0)),
                pl.BlockSpec((C, 9 * C), lambda i: (0, 0)),
                pl.BlockSpec((C, 2), lambda i: (0, 0)),
                pl.BlockSpec((C, 2), lambda i: (0, 0)),
                pl.BlockSpec((9, HW), lambda i: (0, 0)),
            ],
            out_specs=pl.BlockSpec((N, C, HW), lambda i: (0, 0, 0)),
        ),
        compiler_params=pltpu.CompilerParams(
            dimension_semantics=("arbitrary",),
        ),
    )(x_flat, w1, w2, sb1, sb2, masks)

    return out.reshape(N, C, H, W)


# ---------------- reference (plain JAX) for verification ----------------
def _ref_conv_bn(x_nhwc, w_hwio, gamma, beta, mean, var):
    y = jax.lax.conv_general_dilated(
        x_nhwc, w_hwio, window_strides=(1, 1), padding=((1, 1), (1, 1)),
        dimension_numbers=("NHWC", "HWIO", "NHWC"))
    scale = gamma / jnp.sqrt(var + EPS)
    return y * scale + (beta - mean * scale)


def basic_block_reference(x_nchw, params):
    x = jnp.transpose(x_nchw, (0, 2, 3, 1))
    h = jnp.maximum(_ref_conv_bn(x, params["w1"], params["gamma1"], params["beta1"],
                                 params["mean1"], params["var1"]), 0.0)
    out = _ref_conv_bn(h, params["w2"], params["gamma2"], params["beta2"],
                       params["mean2"], params["var2"]) + x
    return jnp.transpose(out, (0, 3, 1, 2))


if __name__ == "__main__":
    key = jax.random.PRNGKey(0)
    ks = jax.random.split(key, 11)

    N, C, H, W = 2, 4, 16, 16      # inplanes = planes = 4, stride = 1, pad = 1, dilation = 1
    x = jax.random.normal(ks[0], (N, C, H, W), jnp.float32)

    params = {
        "w1": jax.random.normal(ks[1], (3, 3, C, C), jnp.float32) * 0.1,   # HWIO
        "w2": jax.random.normal(ks[2], (3, 3, C, C), jnp.float32) * 0.1,
        "gamma1": jax.random.uniform(ks[3], (C,), jnp.float32, 0.5, 1.5),
        "beta1": jax.random.normal(ks[4], (C,), jnp.float32) * 0.1,
        "mean1": jax.random.normal(ks[5], (C,), jnp.float32) * 0.1,
        "var1": jax.random.uniform(ks[6], (C,), jnp.float32, 0.5, 1.5),
        "gamma2": jax.random.uniform(ks[7], (C,), jnp.float32, 0.5, 1.5),
        "beta2": jax.random.normal(ks[8], (C,), jnp.float32) * 0.1,
        "mean2": jax.random.normal(ks[9], (C,), jnp.float32) * 0.1,
        "var2": jax.random.uniform(ks[10], (C,), jnp.float32, 0.5, 1.5),
    }

    out = basic_block_forward(x, params)
    out = jax.block_until_ready(out)

    ref = basic_block_reference(x, params)
    assert out.shape == (N, C, H, W)
    assert jnp.allclose(out, ref, atol=1e-4, rtol=1e-4), "mismatch vs reference"

    print("KERNEL_OK")
</pallas_src>

<mosaic_0001>
module attributes {stable_mosaic.version = 11 : i64} {
  func.func @_basic_block_kernel(%arg0: i32, %arg1: memref<2x4x256xf32, #tpu.memory_space<vmem>>, %arg2: memref<4x36xf32, #tpu.memory_space<vmem>>, %arg3: memref<4x36xf32, #tpu.memory_space<vmem>>, %arg4: memref<4x2xf32, #tpu.memory_space<vmem>>, %arg5: memref<4x2xf32, #tpu.memory_space<vmem>>, %arg6: memref<9x256xf32, #tpu.memory_space<vmem>>, %arg7: memref<2x4x256xf32, #tpu.memory_space<vmem>>) attributes {dimension_semantics = [#tpu.dimension_semantics<arbitrary>], iteration_bounds = array<i64: 1>, scalar_prefetch = 0 : i64, scratch_operands = 0 : i64, tpu.core_type = #tpu.core_type<tc>, window_params = [{pipeline_mode = #tpu.pipeline_mode<synchronous>, transform_indices = @transform_0, window_bounds = array<i64: 2, 4, 256>}, {pipeline_mode = #tpu.pipeline_mode<synchronous>, transform_indices = @transform_1, window_bounds = array<i64: 4, 36>}, {pipeline_mode = #tpu.pipeline_mode<synchronous>, transform_indices = @transform_2, window_bounds = array<i64: 4, 36>}, {pipeline_mode = #tpu.pipeline_mode<synchronous>, transform_indices = @transform_3, window_bounds = array<i64: 4, 2>}, {pipeline_mode = #tpu.pipeline_mode<synchronous>, transform_indices = @transform_4, window_bounds = array<i64: 4, 2>}, {pipeline_mode = #tpu.pipeline_mode<synchronous>, transform_indices = @transform_5, window_bounds = array<i64: 9, 256>}, {pipeline_mode = #tpu.pipeline_mode<synchronous>, transform_indices = @transform_6, window_bounds = array<i64: 2, 4, 256>}]} {
    %c0 = arith.constant 0 : index
    %c0_0 = arith.constant 0 : index
    %0 = vector.load %arg2[%c0, %c0_0] : memref<4x36xf32, #tpu.memory_space<vmem>>, vector<4x36xf32>
    %c0_1 = arith.constant 0 : index
    %c0_2 = arith.constant 0 : index
    %1 = vector.load %arg3[%c0_1, %c0_2] : memref<4x36xf32, #tpu.memory_space<vmem>>, vector<4x36xf32>
    %c0_3 = arith.constant 0 : index
    %c0_4 = arith.constant 0 : index
    %2 = vector.load %arg4[%c0_3, %c0_4] : memref<4x2xf32, #tpu.memory_space<vmem>>, vector<4x1xf32>
    %c0_5 = arith.constant 0 : index
    %c1 = arith.constant 1 : index
    %3 = vector.load %arg4[%c0_5, %c1] : memref<4x2xf32, #tpu.memory_space<vmem>>, vector<4x1xf32>
    %c0_6 = arith.constant 0 : index
    %c0_7 = arith.constant 0 : index
    %4 = vector.load %arg5[%c0_6, %c0_7] : memref<4x2xf32, #tpu.memory_space<vmem>>, vector<4x1xf32>
    %c0_8 = arith.constant 0 : index
    %c1_9 = arith.constant 1 : index
    %5 = vector.load %arg5[%c0_8, %c1_9] : memref<4x2xf32, #tpu.memory_space<vmem>>, vector<4x1xf32>
    %c0_10 = arith.constant 0 : index
    %c0_11 = arith.constant 0 : index
    %6 = vector.load %arg6[%c0_10, %c0_11] : memref<9x256xf32, #tpu.memory_space<vmem>>, vector<1x256xf32>
    %c1_12 = arith.constant 1 : index
    %c0_13 = arith.constant 0 : index
    %7 = vector.load %arg6[%c1_12, %c0_13] : memref<9x256xf32, #tpu.memory_space<vmem>>, vector<1x256xf32>
    %c2 = arith.constant 2 : index
    %c0_14 = arith.constant 0 : index
    %8 = vector.load %arg6[%c2, %c0_14] : memref<9x256xf32, #tpu.memory_space<vmem>>, vector<1x256xf32>
    %c3 = arith.constant 3 : index
    %c0_15 = arith.constant 0 : index
    %9 = vector.load %arg6[%c3, %c0_15] : memref<9x256xf32, #tpu.memory_space<vmem>>, vector<1x256xf32>
    %c4 = arith.constant 4 : index
    %c0_16 = arith.constant 0 : index
    %10 = vector.load %arg6[%c4, %c0_16] : memref<9x256xf32, #tpu.memory_space<vmem>>, vector<1x256xf32>
    %c5 = arith.constant 5 : index
    %c0_17 = arith.constant 0 : index
    %11 = vector.load %arg6[%c5, %c0_17] : memref<9x256xf32, #tpu.memory_space<vmem>>, vector<1x256xf32>
    %c6 = arith.constant 6 : index
    %c0_18 = arith.constant 0 : index
    %12 = vector.load %arg6[%c6, %c0_18] : memref<9x256xf32, #tpu.memory_space<vmem>>, vector<1x256xf32>
    %c7 = arith.constant 7 : index
    %c0_19 = arith.constant 0 : index
    %13 = vector.load %arg6[%c7, %c0_19] : memref<9x256xf32, #tpu.memory_space<vmem>>, vector<1x256xf32>
    %c8 = arith.constant 8 : index
    %c0_20 = arith.constant 0 : index
    %14 = vector.load %arg6[%c8, %c0_20] : memref<9x256xf32, #tpu.memory_space<vmem>>, vector<1x256xf32>
    %c0_21 = arith.constant 0 : index
    %c0_22 = arith.constant 0 : index
    %c0_23 = arith.constant 0 : index
    %15 = vector.load %arg1[%c0_21, %c0_22, %c0_23] : memref<2x4x256xf32, #tpu.memory_space<vmem>>, vector<1x4x256xf32>
    %16 = vector.shape_cast %15 : vector<1x4x256xf32> to vector<4x256xf32>
    %c17_i32 = arith.constant 17 : i32
    %17 = tpu.dynamic_rotate %16 by %c17_i32 dim 1 : vector<4x256xf32>, i32 -> vector<4x256xf32>
    %18 = vector.broadcast %6 : vector<1x256xf32> to vector<4x256xf32>
    %19 = arith.mulf %17, %18 : vector<4x256xf32>
    %c16_i32 = arith.constant 16 : i32
    %20 = tpu.dynamic_rotate %16 by %c16_i32 dim 1 : vector<4x256xf32>, i32 -> vector<4x256xf32>
    %21 = vector.broadcast %7 : vector<1x256xf32> to vector<4x256xf32>
    %22 = arith.mulf %20, %21 : vector<4x256xf32>
    %c15_i32 = arith.constant 15 : i32
    %23 = tpu.dynamic_rotate %16 by %c15_i32 dim 1 : vector<4x256xf32>, i32 -> vector<4x256xf32>
    %24 = vector.broadcast %8 : vector<1x256xf32> to vector<4x256xf32>
    %25 = arith.mulf %23, %24 : vector<4x256xf32>
    %c1_i32 = arith.constant 1 : i32
    %26 = tpu.dynamic_rotate %16 by %c1_i32 dim 1 : vector<4x256xf32>, i32 -> vector<4x256xf32>
    %27 = vector.broadcast %9 : vector<1x256xf32> to vector<4x256xf32>
    %28 = arith.mulf %26, %27 : vector<4x256xf32>
    %29 = vector.broadcast %10 : vector<1x256xf32> to vector<4x256xf32>
    %30 = arith.mulf %16, %29 : vector<4x256xf32>
    %c255_i32 = arith.constant 255 : i32
    %31 = tpu.dynamic_rotate %16 by %c255_i32 dim 1 : vector<4x256xf32>, i32 -> vector<4x256xf32>
    %32 = vector.broadcast %11 : vector<1x256xf32> to vector<4x256xf32>
    %33 = arith.mulf %31, %32 : vector<4x256xf32>
    %c241_i32 = arith.constant 241 : i32
    %34 = tpu.dynamic_rotate %16 by %c241_i32 dim 1 : vector<4x256xf32>, i32 -> vector<4x256xf32>
    %35 = vector.broadcast %12 : vector<1x256xf32> to vector<4x256xf32>
    %36 = arith.mulf %34, %35 : vector<4x256xf32>
    %c240_i32 = arith.constant 240 : i32
    %37 = tpu.dynamic_rotate %16 by %c240_i32 dim 1 : vector<4x256xf32>, i32 -> vector<4x256xf32>
    %38 = vector.broadcast %13 : vector<1x256xf32> to vector<4x256xf32>
    %39 = arith.mulf %37, %38 : vector<4x256xf32>
    %c239_i32 = arith.constant 239 : i32
    %40 = tpu.dynamic_rotate %16 by %c239_i32 dim 1 : vector<4x256xf32>, i32 -> vector<4x256xf32>
    %41 = vector.broadcast %14 : vector<1x256xf32> to vector<4x256xf32>
    %42 = arith.mulf %40, %41 : vector<4x256xf32>
    %43 = tpu.concatenate %19, %22, %25, %28, %30, %33, %36, %39, %42 in 0 : vector<4x256xf32>, vector<4x256xf32>, vector<4x256xf32>, vector<4x256xf32>, vector<4x256xf32>, vector<4x256xf32>, vector<4x256xf32>, vector<4x256xf32>, vector<4x256xf32> -> vector<36x256xf32>
    %cst = arith.constant dense<0.000000e+00> : vector<4x256xf32>
    %44 = tpu.matmul %0, %43, %cst {dimension_numbers = #tpu.dot_dimension_numbers<[1], [0], [0], [1], [0, 0, 1, 1], [], []>} : vector<4x36xf32>, vector<36x256xf32>, vector<4x256xf32> -> vector<4x256xf32>
    %45 = vector.broadcast %2 : vector<4x1xf32> to vector<4x256xf32>
    %46 = arith.mulf %44, %45 : vector<4x256xf32>
    %47 = vector.broadcast %3 : vector<4x1xf32> to vector<4x256xf32>
    %48 = arith.addf %46, %47 : vector<4x256xf32>
    %cst_24 = arith.constant 0.000000e+00 : f32
    %49 = vector.broadcast %cst_24 : f32 to vector<4x256xf32>
    %50 = arith.maximumf %48, %49 : vector<4x256xf32>
    %c17_i32_25 = arith.constant 17 : i32
    %51 = tpu.dynamic_rotate %50 by %c17_i32_25 dim 1 : vector<4x256xf32>, i32 -> vector<4x256xf32>
    %52 = vector.broadcast %6 : vector<1x256xf32> to vector<4x256xf32>
    %53 = arith.mulf %51, %52 : vector<4x256xf32>
    %c16_i32_26 = arith.constant 16 : i32
    %54 = tpu.dynamic_rotate %50 by %c16_i32_26 dim 1 : vector<4x256xf32>, i32 -> vector<4x256xf32>
    %55 = vector.broadcast %7 : vector<1x256xf32> to vector<4x256xf32>
    %56 = arith.mulf %54, %55 : vector<4x256xf32>
    %c15_i32_27 = arith.constant 15 : i32
    %57 = tpu.dynamic_rotate %50 by %c15_i32_27 dim 1 : vector<4x256xf32>, i32 -> vector<4x256xf32>
    %58 = vector.broadcast %8 : vector<1x256xf32> to vector<4x256xf32>
    %59 = arith.mulf %57, %58 : vector<4x256xf32>
    %c1_i32_28 = arith.constant 1 : i32
    %60 = tpu.dynamic_rotate %50 by %c1_i32_28 dim 1 : vector<4x256xf32>, i32 -> vector<4x256xf32>
    %61 = vector.broadcast %9 : vector<1x256xf32> to vector<4x256xf32>
    %62 = arith.mulf %60, %61 : vector<4x256xf32>
    %63 = vector.broadcast %10 : vector<1x256xf32> to vector<4x256xf32>
    %64 = arith.mulf %50, %63 : vector<4x256xf32>
    %c255_i32_29 = arith.constant 255 : i32
    %65 = tpu.dynamic_rotate %50 by %c255_i32_29 dim 1 : vector<4x256xf32>, i32 -> vector<4x256xf32>
    %66 = vector.broadcast %11 : vector<1x256xf32> to vector<4x256xf32>
    %67 = arith.mulf %65, %66 : vector<4x256xf32>
    %c241_i32_30 = arith.constant 241 : i32
    %68 = tpu.dynamic_rotate %50 by %c241_i32_30 dim 1 : vector<4x256xf32>, i32 -> vector<4x256xf32>
    %69 = vector.broadcast %12 : vector<1x256xf32> to vector<4x256xf32>
    %70 = arith.mulf %68, %69 : vector<4x256xf32>
    %c240_i32_31 = arith.constant 240 : i32
    %71 = tpu.dynamic_rotate %50 by %c240_i32_31 dim 1 : vector<4x256xf32>, i32 -> vector<4x256xf32>
    %72 = vector.broadcast %13 : vector<1x256xf32> to vector<4x256xf32>
    %73 = arith.mulf %71, %72 : vector<4x256xf32>
    %c239_i32_32 = arith.constant 239 : i32
    %74 = tpu.dynamic_rotate %50 by %c239_i32_32 dim 1 : vector<4x256xf32>, i32 -> vector<4x256xf32>
    %75 = vector.broadcast %14 : vector<1x256xf32> to vector<4x256xf32>
    %76 = arith.mulf %74, %75 : vector<4x256xf32>
    %77 = tpu.concatenate %53, %56, %59, %62, %64, %67, %70, %73, %76 in 0 : vector<4x256xf32>, vector<4x256xf32>, vector<4x256xf32>, vector<4x256xf32>, vector<4x256xf32>, vector<4x256xf32>, vector<4x256xf32>, vector<4x256xf32>, vector<4x256xf32> -> vector<36x256xf32>
    %cst_33 = arith.constant dense<0.000000e+00> : vector<4x256xf32>
    %78 = tpu.matmul %1, %77, %cst_33 {dimension_numbers = #tpu.dot_dimension_numbers<[1], [0], [0], [1], [0, 0, 1, 1], [], []>} : vector<4x36xf32>, vector<36x256xf32>, vector<4x256xf32> -> vector<4x256xf32>
    %79 = vector.broadcast %4 : vector<4x1xf32> to vector<4x256xf32>
    %80 = arith.mulf %78, %79 : vector<4x256xf32>
    %81 = vector.broadcast %5 : vector<4x1xf32> to vector<4x256xf32>
    %82 = arith.addf %80, %81 : vector<4x256xf32>
    %83 = arith.addf %82, %16 : vector<4x256xf32>
    %c0_34 = arith.constant 0 : index
    %c0_35 = arith.constant 0 : index
    %c0_36 = arith.constant 0 : index
    %84 = vector.load %arg7[%c0_34, %c0_35, %c0_36] : memref<2x4x256xf32, #tpu.memory_space<vmem>>, vector<1x4x256xf32>
    %85 = vector.shape_cast %84 : vector<1x4x256xf32> to vector<4x256xf32>
    %86 = vector.shape_cast %83 : vector<4x256xf32> to vector<1x4x256xf32>
    tpu.vector_store %arg7[%c0_34, %c0_35, %c0_36], %86 {strides = array<i32>} : memref<2x4x256xf32, #tpu.memory_space<vmem>>, vector<1x4x256xf32>,
    %c1_37 = arith.constant 1 : index
    %c0_38 = arith.constant 0 : index
    %c0_39 = arith.constant 0 : index
    %87 = vector.load %arg1[%c1_37, %c0_38, %c0_39] : memref<2x4x256xf32, #tpu.memory_space<vmem>>, vector<1x4x256xf32>
    %88 = vector.shape_cast %87 : vector<1x4x256xf32> to vector<4x256xf32>
    %c17_i32_40 = arith.constant 17 : i32
    %89 = tpu.dynamic_rotate %88 by %c17_i32_40 dim 1 : vector<4x256xf32>, i32 -> vector<4x256xf32>
    %90 = vector.broadcast %6 : vector<1x256xf32> to vector<4x256xf32>
    %91 = arith.mulf %89, %90 : vector<4x256xf32>
    %c16_i32_41 = arith.constant 16 : i32
    %92 = tpu.dynamic_rotate %88 by %c16_i32_41 dim 1 : vector<4x256xf32>, i32 -> vector<4x256xf32>
    %93 = vector.broadcast %7 : vector<1x256xf32> to vector<4x256xf32>
    %94 = arith.mulf %92, %93 : vector<4x256xf32>
    %c15_i32_42 = arith.constant 15 : i32
    %95 = tpu.dynamic_rotate %88 by %c15_i32_42 dim 1 : vector<4x256xf32>, i32 -> vector<4x256xf32>
    %96 = vector.broadcast %8 : vector<1x256xf32> to vector<4x256xf32>
    %97 = arith.mulf %95, %96 : vector<4x256xf32>
    %c1_i32_43 = arith.constant 1 : i32
    %98 = tpu.dynamic_rotate %88 by %c1_i32_43 dim 1 : vector<4x256xf32>, i32 -> vector<4x256xf32>
    %99 = vector.broadcast %9 : vector<1x256xf32> to vector<4x256xf32>
    %100 = arith.mulf %98, %99 : vector<4x256xf32>
    %101 = vector.broadcast %10 : vector<1x256xf32> to vector<4x256xf32>
    %102 = arith.mulf %88, %101 : vector<4x256xf32>
    %c255_i32_44 = arith.constant 255 : i32
    %103 = tpu.dynamic_rotate %88 by %c255_i32_44 dim 1 : vector<4x256xf32>, i32 -> vector<4x256xf32>
    %104 = vector.broadcast %11 : vector<1x256xf32> to vector<4x256xf32>
    %105 = arith.mulf %103, %104 : vector<4x256xf32>
    %c241_i32_45 = arith.constant 241 : i32
    %106 = tpu.dynamic_rotate %88 by %c241_i32_45 dim 1 : vector<4x256xf32>, i32 -> vector<4x256xf32>
    %107 = vector.broadcast %12 : vector<1x256xf32> to vector<4x256xf32>
    %108 = arith.mulf %106, %107 : vector<4x256xf32>
    %c240_i32_46 = arith.constant 240 : i32
    %109 = tpu.dynamic_rotate %88 by %c240_i32_46 dim 1 : vector<4x256xf32>, i32 -> vector<4x256xf32>
    %110 = vector.broadcast %13 : vector<1x256xf32> to vector<4x256xf32>
    %111 = arith.mulf %109, %110 : vector<4x256xf32>
    %c239_i32_47 = arith.constant 239 : i32
    %112 = tpu.dynamic_rotate %88 by %c239_i32_47 dim 1 : vector<4x256xf32>, i32 -> vector<4x256xf32>
    %113 = vector.broadcast %14 : vector<1x256xf32> to vector<4x256xf32>
    %114 = arith.mulf %112, %113 : vector<4x256xf32>
    %115 = tpu.concatenate %91, %94, %97, %100, %102, %105, %108, %111, %114 in 0 : vector<4x256xf32>, vector<4x256xf32>, vector<4x256xf32>, vector<4x256xf32>, vector<4x256xf32>, vector<4x256xf32>, vector<4x256xf32>, vector<4x256xf32>, vector<4x256xf32> -> vector<36x256xf32>
    %cst_48 = arith.constant dense<0.000000e+00> : vector<4x256xf32>
    %116 = tpu.matmul %0, %115, %cst_48 {dimension_numbers = #tpu.dot_dimension_numbers<[1], [0], [0], [1], [0, 0, 1, 1], [], []>} : vector<4x36xf32>, vector<36x256xf32>, vector<4x256xf32> -> vector<4x256xf32>
    %117 = vector.broadcast %2 : vector<4x1xf32> to vector<4x256xf32>
    %118 = arith.mulf %116, %117 : vector<4x256xf32>
    %119 = vector.broadcast %3 : vector<4x1xf32> to vector<4x256xf32>
    %120 = arith.addf %118, %119 : vector<4x256xf32>
    %cst_49 = arith.constant 0.000000e+00 : f32
    %121 = vector.broadcast %cst_49 : f32 to vector<4x256xf32>
    %122 = arith.maximumf %120, %121 : vector<4x256xf32>
    %c17_i32_50 = arith.constant 17 : i32
    %123 = tpu.dynamic_rotate %122 by %c17_i32_50 dim 1 : vector<4x256xf32>, i32 -> vector<4x256xf32>
    %124 = vector.broadcast %6 : vector<1x256xf32> to vector<4x256xf32>
    %125 = arith.mulf %123, %124 : vector<4x256xf32>
    %c16_i32_51 = arith.constant 16 : i32
    %126 = tpu.dynamic_rotate %122 by %c16_i32_51 dim 1 : vector<4x256xf32>, i32 -> vector<4x256xf32>
    %127 = vector.broadcast %7 : vector<1x256xf32> to vector<4x256xf32>
    %128 = arith.mulf %126, %127 : vector<4x256xf32>
    %c15_i32_52 = arith.constant 15 : i32
    %129 = tpu.dynamic_rotate %122 by %c15_i32_52 dim 1 : vector<4x256xf32>, i32 -> vector<4x256xf32>
    %130 = vector.broadcast %8 : vector<1x256xf32> to vector<4x256xf32>
    %131 = arith.mulf %129, %130 : vector<4x256xf32>
    %c1_i32_53 = arith.constant 1 : i32
    %132 = tpu.dynamic_rotate %122 by %c1_i32_53 dim 1 : vector<4x256xf32>, i32 -> vector<4x256xf32>
    %133 = vector.broadcast %9 : vector<1x256xf32> to vector<4x256xf32>
    %134 = arith.mulf %132, %133 : vector<4x256xf32>
    %135 = vector.broadcast %10 : vector<1x256xf32> to vector<4x256xf32>
    %136 = arith.mulf %122, %135 : vector<4x256xf32>
    %c255_i32_54 = arith.constant 255 : i32
    %137 = tpu.dynamic_rotate %122 by %c255_i32_54 dim 1 : vector<4x256xf32>, i32 -> vector<4x256xf32>
    %138 = vector.broadcast %11 : vector<1x256xf32> to vector<4x256xf32>
    %139 = arith.mulf %137, %138 : vector<4x256xf32>
    %c241_i32_55 = arith.constant 241 : i32
    %140 = tpu.dynamic_rotate %122 by %c241_i32_55 dim 1 : vector<4x256xf32>, i32 -> vector<4x256xf32>
    %141 = vector.broadcast %12 : vector<1x256xf32> to vector<4x256xf32>
    %142 = arith.mulf %140, %141 : vector<4x256xf32>
    %c240_i32_56 = arith.constant 240 : i32
    %143 = tpu.dynamic_rotate %122 by %c240_i32_56 dim 1 : vector<4x256xf32>, i32 -> vector<4x256xf32>
    %144 = vector.broadcast %13 : vector<1x256xf32> to vector<4x256xf32>
    %145 = arith.mulf %143, %144 : vector<4x256xf32>
    %c239_i32_57 = arith.constant 239 : i32
    %146 = tpu.dynamic_rotate %122 by %c239_i32_57 dim 1 : vector<4x256xf32>, i32 -> vector<4x256xf32>
    %147 = vector.broadcast %14 : vector<1x256xf32> to vector<4x256xf32>
    %148 = arith.mulf %146, %147 : vector<4x256xf32>
    %149 = tpu.concatenate %125, %128, %131, %134, %136, %139, %142, %145, %148 in 0 : vector<4x256xf32>, vector<4x256xf32>, vector<4x256xf32>, vector<4x256xf32>, vector<4x256xf32>, vector<4x256xf32>, vector<4x256xf32>, vector<4x256xf32>, vector<4x256xf32> -> vector<36x256xf32>
    %cst_58 = arith.constant dense<0.000000e+00> : vector<4x256xf32>
    %150 = tpu.matmul %1, %149, %cst_58 {dimension_numbers = #tpu.dot_dimension_numbers<[1], [0], [0], [1], [0, 0, 1, 1], [], []>} : vector<4x36xf32>, vector<36x256xf32>, vector<4x256xf32> -> vector<4x256xf32>
    %151 = vector.broadcast %4 : vector<4x1xf32> to vector<4x256xf32>
    %152 = arith.mulf %150, %151 : vector<4x256xf32>
    %153 = vector.broadcast %5 : vector<4x1xf32> to vector<4x256xf32>
    %154 = arith.addf %152, %153 : vector<4x256xf32>
    %155 = arith.addf %154, %88 : vector<4x256xf32>
    %c1_59 = arith.constant 1 : index
    %c0_60 = arith.constant 0 : index
    %c0_61 = arith.constant 0 : index
    %156 = vector.load %arg7[%c1_59, %c0_60, %c0_61] : memref<2x4x256xf32, #tpu.memory_space<vmem>>, vector<1x4x256xf32>
    %157 = vector.shape_cast %156 : vector<1x4x256xf32> to vector<4x256xf32>
    %158 = vector.shape_cast %155 : vector<4x256xf32> to vector<1x4x256xf32>
    tpu.vector_store %arg7[%c1_59, %c0_60, %c0_61], %158 {strides = array<i32>} : memref<2x4x256xf32, #tpu.memory_space<vmem>>, vector<1x4x256xf32>,
    return
  }
  func.func @transform_0(%arg0: i32) -> (i32, i32, i32) {
    %c0_i32 = arith.constant 0 : i32
    %c0_i32_0 = arith.constant 0 : i32
    %c0_i32_1 = arith.constant 0 : i32
    %c0_i32_2 = arith.constant 0 : i32
    return %c0_i32, %c0_i32_0, %c0_i32_1 : i32, i32, i32
  }
  func.func @transform_1(%arg0: i32) -> (i32, i32) {
    %c0_i32 = arith.constant 0 : i32
    %c0_i32_0 = arith.constant 0 : i32
    %c0_i32_1 = arith.constant 0 : i32
    return %c0_i32, %c0_i32_0 : i32, i32
  }
  func.func @transform_2(%arg0: i32) -> (i32, i32) {
    %c0_i32 = arith.constant 0 : i32
    %c0_i32_0 = arith.constant 0 : i32
    %c0_i32_1 = arith.constant 0 : i32
    return %c0_i32, %c0_i32_0 : i32, i32
  }
  func.func @transform_3(%arg0: i32) -> (i32, i32) {
    %c0_i32 = arith.constant 0 : i32
    %c0_i32_0 = arith.constant 0 : i32
    %c0_i32_1 = arith.constant 0 : i32
    return %c0_i32, %c0_i32_0 : i32, i32
  }
  func.func @transform_4(%arg0: i32) -> (i32, i32) {
    %c0_i32 = arith.constant 0 : i32
    %c0_i32_0 = arith.constant 0 : i32
    %c0_i32_1 = arith.constant 0 : i32
    return %c0_i32, %c0_i32_0 : i32, i32
  }
  func.func @transform_5(%arg0: i32) -> (i32, i32) {
    %c0_i32 = arith.constant 0 : i32
    %c0_i32_0 = arith.constant 0 : i32
    %c0_i32_1 = arith.constant 0 : i32
    return %c0_i32, %c0_i32_0 : i32, i32
  }
  func.func @transform_6(%arg0: i32) -> (i32, i32, i32) {
    %c0_i32 = arith.constant 0 : i32
    %c0_i32_0 = arith.constant 0 : i32
    %c0_i32_1 = arith.constant 0 : i32
    %c0_i32_2 = arith.constant 0 : i32
    return %c0_i32, %c0_i32_0, %c0_i32_1 : i32, i32, i32
  }
}

</mosaic_0001>

<bundles_post_ra>
// kernel: tpu_custom_call.1
= control target key start
LH: loop header
LB: loop body
LE: loop exit
PB: predicated region body
PF: predicated region fallthrough
CT: control target
= control target key end

     0   :  { %11 = vsyncpa [#allocation3], 0  ;;  %s1641_s0 = inlined_call_operand.hbm [shape: f32[2,4,256], index: 0, kind: input, shape index: {}]   ;;  %s1642_s1 = inlined_call_operand.vmem [shape: f32[4,36], index: 1, kind: input, shape index: {}]   ;;  %s1643_s2 = inlined_call_operand.vmem [shape: f32[4,36], index: 2, kind: input, shape index: {}]   ;;  %s1644_s3 = inlined_call_operand.vmem [shape: f32[4,2], index: 3, kind: input, shape index: {}]   ;;  %s1645_s4 = inlined_call_operand.vmem [shape: f32[4,2], index: 4, kind: input, shape index: {}]   ;;  %s1646_s5 = inlined_call_operand.hbm [shape: f32[9,256], index: 5, kind: input, shape index: {}]   ;;  %s1647_s6 = inlined_call_operand.hbm [shape: f32[2,4,256], index: 6, kind: output, shape index: {}]  }
   0x1   :  { %12 = vsyncpa [#allocation6], 0 }
   0x2   :  { %13 = vsyncpa [#allocation4], 0  ;;  %s1077_s21 = smov [#allocation2]  }
   0x3   :  { %s19_s22 = sshll.u32 %s1077_s21, 4  ;;  %s20_s22 = int_to_ptr.vmem [resolvable:$true] %s19_s22 }
   0x4   :  { %s1019_s23 = scalar_lea.vmem %s20_s22, 256  ;;  %p1024_p1 = scmp.lt.s32.totalorder %s20_s22, %s20_s22 }
   0x5   :  { %p1020_p0 = scmp.ne.s32.totalorder %s20_s22, %s1019_s23  ;;  %p1025_p2 = scmp.lt.s32.totalorder %s1019_s23, %s1019_s23 }
   0x7   :  { %p1026_p3 = por %p1025_p2, %p1024_p1 }
   0x9   :  { %p1027_p4 = pnand %p1026_p3, %p1020_p0 }
   0xb   :  { %1030 = shalt.err (!%p1027_p4)
}
   0xc   :  { %s1078_s24 = smov 128   ;;  %s1079_s25 = smov 8  }
   0xd   :  { %25 = dma.hbm_to_vmem [thread:$0]  %s1641_s0, 256, %s20_s22, [#allocation3], %s1078_s24, %s1078_s24, %s1079_s25  }
   0xe   :  { %s1080_s28 = smov [#allocation5]  }
   0xf   :  { %s39_s29 = sshll.u32 %s1080_s28, 4  ;;  %s40_s29 = int_to_ptr.vmem [resolvable:$true] %s39_s29 }
  0x10   :  { %s1039_s30 = scalar_lea.vmem %s40_s29, 512  ;;  %p1044_p6 = scmp.lt.s32.totalorder %s40_s29, %s40_s29 }
  0x11   :  { %p1040_p5 = scmp.ne.s32.totalorder %s40_s29, %s1039_s30  ;;  %p1045_p7 = scmp.lt.s32.totalorder %s1039_s30, %s1039_s30 }
  0x13   :  { %p1046_p8 = por %p1045_p7, %p1044_p6 }
  0x15   :  { %p1047_p9 = pnand %p1046_p8, %p1040_p5 }
  0x17   :  { %1050 = shalt.err (!%p1047_p9)
}
  0x18   :  { %s1081_s7 = smov 256   ;;  %s1082_s8 = smov 16  }
  0x19   :  { %45 = dma.hbm_to_vmem [thread:$0]  %s1646_s5, 512, %s40_s29, [#allocation6], %s1081_s7, %s1081_s7, %s1082_s8  }
  0x1a   :  { %1071 = dma.done.wait [#allocation3], 256  }
  0x1b   :  { %1072 = vsyncadd [#allocation3], 4294967040 }
  0x1c   :  { %1073 = dma.done.wait [#allocation6], 512  }
  0x1d   :  { %1074 = vsyncadd [#allocation6], 4294966784  ;;  %v1139_v0 = vld [vmem:[#allocation2] sm:$0xff]  ;;  %s1083_s0 = smov 111   ;;  %s1084_s11 = smov 112   ;;  %v1088_v2 = vmov 0.0   ;;  %v81_v8 = vlaneseq }
  0x1e   :  { %233 = vrot.lane.b32.xlu1 %v1139_v0, %s1083_s0  ;;  %213 = vrot.lane.b32.xlu0 %v1139_v0, %s1084_s11  ;;  %v1147_v1 = vcombine.high %v1139_v0, %v1139_v0  ;;  %s1085_s12 = smov 127   ;;  %s1086_s5 = smov 113   ;;  %v1175_v3 = vld [vmem:[#allocation2 + $0x8] sm:$0xff]  ;;  %v1091_v5 = vmov 0   ;;  %v1092_v6 = vmov 1   ;;  %vm280_vm2 = vcmask 1043456  }
  0x1f   :  { %s1087_s13 = smov 1   ;;  %363 = vmatprep.mubr.f32.mxu0 %v1088_v2  ;;  %556 = vmatprep.mubr.f32.mxu1 %v1088_v2  ;;  %s1089_s14 = smov 15   ;;  %v1183_v4 = vcombine.high %v1175_v3, %v1175_v3  ;;  %v54_v7 = vld [vmem:[%s1644_s3] sm:$0xf]  ;;  %v88_v9 = vshrl.u32 %v81_v8, 7  ;;  %v1220_v11 = vand.u32 127, %v81_v8 }
  0x20   :  { %s1090_s15 = smov 17   ;;  %1005 = vset.pattern.permute.xlu0 %v1091_v5  ;;  %1006 = vset.pattern.permute.xlu1 %v1092_v6  ;;  %v64_v10 = vld [vmem:[#allocation5 + $0x4] ss:$8 sm:$0x3]  ;;  %vm289_vm9 = vcmask 293888  }
  0x21   :  { %v1222_v12 = vsub.s32 0, %v88_v9  ;;  %v1224_v13 = vsub.s32 1, %v88_v9  ;;  %v72_v14 = vld [vmem:[#allocation5 + $0x10] ss:$8 sm:$0x3]  ;;  %vm237_vm0 = vcmp.lt.s32.totalorder %v1220_v11, 111 }
  0x22   :  { %173 = vrot.lane.b32.xlu0 %v1139_v0, %s1085_s12  ;;  %235 = vrot.lane.b32.xlu1 %v1147_v1, %s1083_s0  ;;  %v66_v20 = vld [vmem:[#allocation5 + $0x5] ss:$8 sm:$0x3]  ;;  %v70_v22 = vld [vmem:[#allocation5 + $0x7] ss:$8 sm:$0x3] }
  0x23   :  { %v1227_v17 = vrot.slane %v64_v10, %v1222_v12  ;;  %v1230_v18 = vrot.slane %v64_v10, %v1224_v13  ;;  %v1234_v19 = vrot.slane %v72_v14, %v1222_v12  ;;  %v1237_v21 = vrot.slane %v72_v14, %v1224_v13  ;;  %v68_v29 = vld [vmem:[#allocation5 + $0x6] ss:$8 sm:$0x3]  ;;  %v62_v58 = vld [vmem:[#allocation5 + $0x3] ss:$8 sm:$0x3] }
  0x24   :  { %vm177_vm1 = vcmp.lt.s32.totalorder %v1220_v11, 127  ;;  %v1249_v28 = vrot.slane %v66_v20, %v1224_v13  ;;  %vm217_vm3 = vcmp.lt.s32.totalorder %v1220_v11, 112  ;;  %v1254_v31 = vrot.slane %v70_v22, %v1222_v12  ;;  %v58_v10 = vld [vmem:[#allocation5 + $0x1] ss:$8 sm:$0x3] }
  0x25   :  { %v1242_v25 = vcombine.low %v1227_v17, %v1230_v18  ;;  %v1257_v32 = vrot.slane %v70_v22, %v1224_v13  ;;  %v1261_v34 = vrot.slane %v66_v20, %v1222_v12  ;;  %vm197_vm4 = vcmp.lt.s32.totalorder %v1220_v11, 113 }
  0x26   :  { %175 = vrot.lane.b32.xlu1 %v1147_v1, %s1085_s12  ;;  %215 = vrot.lane.b32.xlu0 %v1147_v1, %s1084_s11  ;;  %v1266_v37 = vrot.slane %v68_v29, %v1222_v12  ;;  %v1283_v46 = vrot.slane %v68_v29, %v1224_v13  ;;  %vm143_vm5 = vcmp.lt.s32.totalorder %v1220_v11, 1  ;;  %vm103_vm6 = vcmp.lt.s32.totalorder %v1220_v11, 16 }
  0x27   :  { %v172_v38 = vmul.f32 %v1242_v25, %v1139_v0  ;;  %vm123_vm7 = vcmp.lt.s32.totalorder %v1220_v11, 15  ;;  %vm83_vm8 = vcmp.lt.s32.totalorder %v1220_v11, 17 }
  0x29   :  { %v266_v53 = vcombine.high %v172_v38, %v172_v38 }
  0x2a   :  { %195 = vrot.lane.b32.xlu1 %v1147_v1, %s1086_s5  ;;  %193 = vrot.lane.b32.xlu0 %v1139_v0, %s1086_s5 }
  0x2e   :  { %141 = vrot.lane.b32.xlu1 %v1147_v1, %s1087_s13  ;;  %139 = vrot.lane.b32.xlu0 %v1139_v0, %s1087_s13 }
  0x32   :  { %101 = vrot.lane.b32.xlu1 %v1147_v1, %s1082_s8  ;;  %99 = vrot.lane.b32.xlu0 %v1139_v0, %s1082_s8 }
  0x36   :  { %121 = vrot.lane.b32.xlu1 %v1147_v1, %s1089_s14  ;;  %119 = vrot.lane.b32.xlu0 %v1139_v0, %s1089_s14 }
  0x3a   :  { %79 = vrot.lane.b32.xlu1 %v1147_v1, %s1090_s15  ;;  %77 = vrot.lane.b32.xlu0 %v1139_v0, %s1090_s15 }
  0x3e   :  { %639 = vrot.lane.b32.xlu1 %v1183_v4, %s1084_s11  ;;  %637 = vrot.lane.b32.xlu0 %v1175_v3, %s1084_s11 }
  0x42   :  { %647 = vrot.lane.b32.xlu1 %v1183_v4, %s1083_s0  ;;  %645 = vrot.lane.b32.xlu0 %v1175_v3, %s1083_s0 }
  0x46   :  { %623 = vrot.lane.b32.xlu1 %v1183_v4, %s1085_s12  ;;  %621 = vrot.lane.b32.xlu0 %v1175_v3, %s1085_s12 }
  0x4a   :  { %631 = vrot.lane.b32.xlu1 %v1183_v4, %s1086_s5  ;;  %629 = vrot.lane.b32.xlu0 %v1175_v3, %s1086_s5 }
  0x4e   :  { %614 = vrot.lane.b32.xlu1 %v1183_v4, %s1087_s13  ;;  %612 = vrot.lane.b32.xlu0 %v1175_v3, %s1087_s13 }
  0x52   :  { %598 = vrot.lane.b32.xlu1 %v1183_v4, %s1082_s8  ;;  %596 = vrot.lane.b32.xlu0 %v1175_v3, %s1082_s8 }
  0x56   :  { %606 = vrot.lane.b32.xlu1 %v1183_v4, %s1089_s14  ;;  %604 = vrot.lane.b32.xlu0 %v1175_v3, %s1089_s14 }
  0x5a   :  { %590 = vrot.lane.b32.xlu1 %v1183_v4, %s1090_s15  ;;  %588 = vrot.lane.b32.xlu0 %v1175_v3, %s1090_s15 }
  0x5e   :  { %372 = vperm.xlu0 %1005, %v54_v7   ;;  %378 = vperm.xlu1 %1006, %v54_v7  }
  0x62   :  { %1007 = vset.pattern.permute.xlu1 %v1091_v5  ;;  %1008 = vset.pattern.permute.xlu0 %v1092_v6  ;;  %v1296_v5 = vrot.slane %v62_v58, %v1222_v12  ;;  %v1299_v6 = vrot.slane %v62_v58, %v1224_v13 }
  0x90   :  { %v234_v15 = vpop.permute.xlu1 %233  ;;  %v214_v16 = vpop.permute.xlu0 %213 }
  0x94   :  { %v174_v23 = vpop.permute.xlu0 %173  ;;  %v236_v24 = vpop.permute.xlu1 %235 }
  0x95   :  { %v238_v26 = vsel %vm237_vm0, %v234_v15, %v236_v24  ;;  %v239_v27 = vsel %vm237_vm0, %v236_v24, %v234_v15  ;;  %v60_v15 = vld [vmem:[#allocation5 + $0x2] ss:$8 sm:$0x3]  ;;  %v1311_v24 = vrot.slane %v58_v10, %v1222_v12 }
  0x96   :  { %v251_v30 = vmul.f32 %v1234_v19, %v238_v26  ;;  %v252_v33 = vmul.f32 %v1237_v21, %v239_v27  ;;  %v56_v26 = vld [vmem:[#allocation5] ss:$8 sm:$0x3]  ;;  %v1314_v27 = vrot.slane %v58_v10, %v1224_v13  ;;  %v1318_v29 = vrot.slane %v60_v15, %v1222_v12 }
  0x98   :  { %v176_v35 = vpop.permute.xlu1 %175  ;;  %v216_v36 = vpop.permute.xlu0 %215  ;;  %976 = vmatprep.subr.msk.mxu0 %vm280_vm2, %v252_v33 }
  0x99   :  { %v178_v39 = vsel %vm177_vm1, %v174_v23, %v176_v35  ;;  %v179_v40 = vsel %vm177_vm1, %v176_v35, %v174_v23  ;;  %v218_v41 = vsel %vm217_vm3, %v214_v16, %v216_v36  ;;  %v219_v42 = vsel %vm217_vm3, %v216_v36, %v214_v16  ;;  %977 = vmatpush1.msk.msra.mxu0 %vm280_vm2, %v251_v30 }
  0x9a   :  { %v192_v43 = vmul.f32 %v1249_v28, %v179_v40  ;;  %v231_v44 = vmul.f32 %v1254_v31, %v218_v41  ;;  %v232_v45 = vmul.f32 %v1257_v32, %v219_v42  ;;  %v191_v47 = vmul.f32 %v1261_v34, %v178_v39 }
  0x9b   :  { %v1321_v30 = vrot.slane %v60_v15, %v1224_v13  ;;  %v1329_v39 = vrot.slane %v56_v26, %v1222_v12  ;;  %v1332_v40 = vrot.slane %v56_v26, %v1224_v13 }
  0x9c   :  { %v196_v48 = vpop.permute.xlu1 %195  ;;  %v194_v49 = vpop.permute.xlu0 %193  ;;  %v271_v50 = vrot.slane %v192_v43, 4  ;;  %v276_v54 = vrot.slane %v231_v44, 4  ;;  %v277_v55 = vrot.slane %v232_v45, 4  ;;  %v270_v59 = vrot.slane %v191_v47, 4 }
  0x9d   :  { %v198_v51 = vsel %vm197_vm4, %v194_v49, %v196_v48  ;;  %v199_v52 = vsel %vm197_vm4, %v196_v48, %v194_v49 }
  0x9e   :  { %v211_v56 = vmul.f32 %v1266_v37, %v198_v51  ;;  %v212_v57 = vmul.f32 %v1283_v46, %v199_v52  ;;  %v286_v9 = vsel %vm280_vm2, %v266_v53, %v271_v50  ;;  %v285_v14 = vsel %vm280_vm2, %v172_v38, %v270_v59 }
  0xa0   :  { %v142_v60 = vpop.permute.xlu1 %141  ;;  %v140_v61 = vpop.permute.xlu0 %139  ;;  %v288_v62 = vsel %vm280_vm2, %v212_v57, %v277_v55  ;;  %v287_v63 = vsel %vm280_vm2, %v211_v56, %v276_v54 }
  0xa1   :  { %323 = vmatprep.subr.mxu0 %v288_v62  ;;  %v144_v7 = vsel %vm143_vm5, %v140_v61, %v142_v60  ;;  %v145_v8 = vsel %vm143_vm5, %v142_v60, %v140_v61  ;;  %v1355_v62 = vld [vmem:[%s1642_s1] sm:$0xf] }
  0xa2   :  { %324 = vmatpush1.msra.mxu0 %v287_v63  ;;  %v157_v22 = vmul.f32 %v1296_v5, %v145_v8  ;;  %v158_v23 = vmul.f32 %v1299_v6, %v144_v7 }
  0xa3   :  { %325 = vmatprep.subr.mxu0 %v286_v9 }
  0xa4   :  { %v102_v16 = vpop.permute.xlu1 %101  ;;  %v100_v20 = vpop.permute.xlu0 %99  ;;  %326 = vmatpush1.msra.mxu0 %v285_v14  ;;  %v261_v41 = vrot.slane %v157_v22, 4  ;;  %v262_v42 = vrot.slane %v158_v23, 4 }
  0xa5   :  { %v104_v33 = vsel %vm103_vm6, %v100_v20, %v102_v16  ;;  %v105_v35 = vsel %vm103_vm6, %v102_v16, %v100_v20 }
  0xa6   :  { %v117_v45 = vmul.f32 %v1311_v24, %v105_v35  ;;  %v118_v47 = vmul.f32 %v1314_v27, %v104_v33  ;;  %v620_v35 = vmul.f32 %v1175_v3, %v1242_v25 }
  0xa8   :  { %v122_v36 = vpop.permute.xlu1 %121  ;;  %v120_v38 = vpop.permute.xlu0 %119  ;;  %v255_v54 = vrot.slane %v117_v45, 4  ;;  %v256_v55 = vrot.slane %v118_v47, 4 }
  0xa9   :  { %v124_v43 = vsel %vm123_vm7, %v120_v38, %v122_v36  ;;  %v125_v44 = vsel %vm123_vm7, %v122_v36, %v120_v38 }
  0xaa   :  { %v137_v48 = vmul.f32 %v1318_v29, %v125_v44  ;;  %v138_v12 = vmul.f32 %v1321_v30, %v124_v43 }
  0xac   :  { %v80_v49 = vpop.permute.xlu1 %79  ;;  %v78_v50 = vpop.permute.xlu0 %77  ;;  %v284_v13 = vsel %vm280_vm2, %v138_v12, %v262_v42  ;;  %v283_v51 = vsel %vm280_vm2, %v137_v48, %v261_v41  ;;  %v666_v48 = vcombine.high %v620_v35, %v620_v35 }
  0xad   :  { %v84_v52 = vsel %vm83_vm8, %v78_v50, %v80_v49  ;;  %v85_v53 = vsel %vm83_vm8, %v80_v49, %v78_v50  ;;  %327 = vmatprep.subr.mxu0 %v284_v13 }
  0xae   :  { %v97_v56 = vmul.f32 %v1329_v39, %v85_v53  ;;  %v98_v57 = vmul.f32 %v1332_v40, %v84_v52  ;;  %328 = vmatpush1.msra.mxu0 %v283_v51 }
  0xb0   :  { %v640_v58 = vpop.permute.xlu1 %639  ;;  %v638_v59 = vpop.permute.xlu0 %637  ;;  %v282_v60 = vsel %vm280_vm2, %v98_v57, %v256_v55  ;;  %v281_v61 = vsel %vm280_vm2, %v97_v56, %v255_v54 }
  0xb1   :  { %329 = vmatprep.subr.mxu0 %v282_v60  ;;  %v641_v10 = vsel %vm217_vm3, %v638_v59, %v640_v58  ;;  %v642_v16 = vsel %vm217_vm3, %v640_v58, %v638_v59 }
  0xb2   :  { %330 = vmatpush1.msra.mxu0 %v281_v61  ;;  %v643_v23 = vmul.f32 %v641_v10, %v1254_v31  ;;  %v644_v36 = vmul.f32 %v642_v16, %v1257_v32 }
  0xb3   :  { %978 = vmatmul.mubr.msk.f32.vlgmr.msra.gmra.mxu0 %vm289_vm9, %v1355_v62 }
  0xb4   :  { %v648_v63 = vpop.permute.xlu1 %647  ;;  %v646_v7 = vpop.permute.xlu0 %645  ;;  %758 = vmatprep.mubr.f32.mxu0 %v1088_v2  ;;  %v676_v44 = vrot.slane %v643_v23, 4  ;;  %v677_v12 = vrot.slane %v644_v36, 4 }
  0xb5   :  { %v649_v8 = vsel %vm237_vm0, %v646_v7, %v648_v63  ;;  %v650_v9 = vsel %vm237_vm0, %v648_v63, %v646_v7 }
  0xb6   :  { %v651_v14 = vmul.f32 %v649_v8, %v1234_v19  ;;  %v652_v15 = vmul.f32 %v650_v9, %v1237_v21 }
  0xb8   :  { %v624_v20 = vpop.permute.xlu1 %623  ;;  %v622_v22 = vpop.permute.xlu0 %621  ;;  %982 = vmatprep.subr.msk.mxu0 %vm280_vm2, %v652_v15 }
  0xb9   :  { %v625_v26 = vsel %vm177_vm1, %v622_v22, %v624_v20  ;;  %v626_v33 = vsel %vm177_vm1, %v624_v20, %v622_v22  ;;  %983 = vmatpush1.msk.msra.mxu0 %vm280_vm2, %v651_v14 }
  0xba   :  { %v628_v38 = vmul.f32 %v626_v33, %v1249_v28  ;;  %v627_v41 = vmul.f32 %v625_v26, %v1261_v34 }
  0xbc   :  { %v632_v42 = vpop.permute.xlu1 %631  ;;  %v630_v43 = vpop.permute.xlu0 %629  ;;  %v671_v49 = vrot.slane %v628_v38, 4  ;;  %v670_v13 = vrot.slane %v627_v41, 4 }
  0xbd   :  { %v633_v45 = vsel %vm197_vm4, %v630_v43, %v632_v42  ;;  %v634_v47 = vsel %vm197_vm4, %v632_v42, %v630_v43 }
  0xbe   :  { %v635_v25 = vmul.f32 %v633_v45, %v1266_v37  ;;  %v636_v50 = vmul.f32 %v634_v47, %v1283_v46  ;;  %v685_v57 = vsel %vm280_vm2, %v666_v48, %v671_v49  ;;  %v684_v58 = vsel %vm280_vm2, %v620_v35, %v670_v13 }
  0xc0   :  { %v615_v51 = vpop.permute.xlu1 %614  ;;  %v613_v52 = vpop.permute.xlu0 %612  ;;  %v687_v53 = vsel %vm280_vm2, %v636_v50, %v677_v12  ;;  %v686_v54 = vsel %vm280_vm2, %v635_v25, %v676_v44 }
  0xc1   :  { %718 = vmatprep.subr.mxu0 %v687_v53  ;;  %v616_v55 = vsel %vm143_vm5, %v613_v52, %v615_v51  ;;  %v617_v56 = vsel %vm143_vm5, %v615_v51, %v613_v52 }
  0xc2   :  { %719 = vmatpush1.msra.mxu0 %v686_v54  ;;  %v618_v61 = vmul.f32 %v617_v56, %v1296_v5  ;;  %v619_v63 = vmul.f32 %v616_v55, %v1299_v6 }
  0xc3   :  { %720 = vmatprep.subr.mxu0 %v685_v57 }
  0xc4   :  { %v599_v59 = vpop.permute.xlu1 %598  ;;  %v597_v60 = vpop.permute.xlu0 %596  ;;  %721 = vmatpush1.msra.mxu0 %v684_v58  ;;  %v661_v14 = vrot.slane %v618_v61, 4  ;;  %v662_v15 = vrot.slane %v619_v63, 4 }
  0xc5   :  { %v600_v7 = vsel %vm103_vm6, %v597_v60, %v599_v59  ;;  %v601_v8 = vsel %vm103_vm6, %v599_v59, %v597_v60 }
  0xc6   :  { %v602_v22 = vmul.f32 %v601_v8, %v1311_v24  ;;  %v603_v23 = vmul.f32 %v600_v7, %v1314_v27 }
  0xc8   :  { %v607_v9 = vpop.permute.xlu1 %606  ;;  %v605_v10 = vpop.permute.xlu0 %604  ;;  %v655_v44 = vrot.slane %v602_v22, 4  ;;  %v656_v45 = vrot.slane %v603_v23, 4 }
  0xc9   :  { %v608_v16 = vsel %vm123_vm7, %v605_v10, %v607_v9  ;;  %v609_v20 = vsel %vm123_vm7, %v607_v9, %v605_v10  ;;  %v55_v9 = vld [vmem:[%s1645_s4] sm:$0xf] }
  0xca   :  { %v610_v26 = vmul.f32 %v609_v20, %v1318_v29  ;;  %v611_v33 = vmul.f32 %v608_v16, %v1321_v30 }
  0xcc   :  { %v591_v35 = vpop.permute.xlu1 %590  ;;  %v589_v36 = vpop.permute.xlu0 %588  ;;  %v683_v38 = vsel %vm280_vm2, %v611_v33, %v662_v15  ;;  %v682_v41 = vsel %vm280_vm2, %v610_v26, %v661_v14 }
  0xcd   :  { %v592_v42 = vsel %vm83_vm8, %v589_v36, %v591_v35  ;;  %v593_v43 = vsel %vm83_vm8, %v591_v35, %v589_v36  ;;  %722 = vmatprep.subr.mxu0 %v683_v38 }
  0xce   :  { %v594_v47 = vmul.f32 %v593_v43, %v1329_v39  ;;  %v595_v48 = vmul.f32 %v592_v42, %v1332_v40  ;;  %723 = vmatpush1.msra.mxu0 %v682_v41 }
  0xd0   :  { %v681_v12 = vsel %vm280_vm2, %v595_v48, %v656_v45  ;;  %v680_v49 = vsel %vm280_vm2, %v594_v47, %v655_v44 }
  0xd1   :  { %724 = vmatprep.subr.mxu0 %v681_v12 }
  0xd2   :  { %725 = vmatpush1.msra.mxu0 %v680_v49 }
  0xd3   :  { %984 = vmatmul.mubr.msk.f32.vlgmr.msra.gmra.mxu0 %vm289_vm9, %v1355_v62 }
  0xd9   :  { %v373_v25 = vpop.permute.xlu0 %372  ;;  %v379_v13 = vpop.permute.xlu1 %378 }
 0x173   :  { %v365_v50 = vpop.f32.mrf.mxu0 }
 0x174   :  { %v375_v51 = vmul.f32 %v373_v25, %v365_v50 }
 0x175   :  { %v367_v52 = vpop.f32.mrf.mxu0 }
 0x176   :  { %v381_v53 = vadd.f32 %v379_v13, %v375_v51  ;;  %v376_v54 = vmul.f32 %v373_v25, %v367_v52 }
 0x178   :  { %v1422_v55 = vmax.f32 %v381_v53, 0.0  ;;  %v382_v56 = vadd.f32 %v379_v13, %v376_v54 }
 0x17a   :  { %v1424_v57 = vmax.f32 %v382_v56, 0.0  ;;  %435 = vrot.lane.b32.xlu1 %v1422_v55, %s1084_s11 }
 0x17c   :  { %437 = vrot.lane.b32.xlu0 %v1424_v57, %s1084_s11 }
 0x17e   :  { %443 = vrot.lane.b32.xlu1 %v1422_v55, %s1083_s0 }
 0x180   :  { %445 = vrot.lane.b32.xlu0 %v1424_v57, %s1083_s0 }
 0x182   :  { %419 = vrot.lane.b32.xlu1 %v1422_v55, %s1085_s12 }
 0x184   :  { %421 = vrot.lane.b32.xlu0 %v1424_v57, %s1085_s12 }
 0x186   :  { %427 = vrot.lane.b32.xlu1 %v1422_v55, %s1086_s5 }
 0x188   :  { %429 = vrot.lane.b32.xlu0 %v1424_v57, %s1086_s5 }
 0x18a   :  { %409 = vrot.lane.b32.xlu1 %v1422_v55, %s1087_s13 }
 0x18c   :  { %411 = vrot.lane.b32.xlu0 %v1424_v57, %s1087_s13 }
 0x18e   :  { %393 = vrot.lane.b32.xlu1 %v1422_v55, %s1082_s8 }
 0x190   :  { %395 = vrot.lane.b32.xlu0 %v1424_v57, %s1082_s8 }
 0x192   :  { %401 = vrot.lane.b32.xlu1 %v1422_v55, %s1089_s14 }
 0x193   :  { %v760_v62 = vpop.f32.mrf.mxu0 }
 0x194   :  { %v765_v58 = vmul.f32 %v760_v62, %v373_v25  ;;  %403 = vrot.lane.b32.xlu0 %v1424_v57, %s1089_s14 }
 0x195   :  { %v762_v59 = vpop.f32.mrf.mxu0 }
 0x196   :  { %v767_v60 = vadd.f32 %v765_v58, %v379_v13  ;;  %v766_v61 = vmul.f32 %v762_v59, %v373_v25  ;;  %385 = vrot.lane.b32.xlu1 %v1422_v55, %s1090_s15 }
 0x198   :  { %v1456_v63 = vmax.f32 %v767_v60, 0.0  ;;  %v768_v7 = vadd.f32 %v766_v61, %v379_v13  ;;  %387 = vrot.lane.b32.xlu0 %v1424_v57, %s1090_s15  ;;  %v418_v60 = vmul.f32 %v1424_v57, %v1230_v18  ;;  %v417_v61 = vmul.f32 %v1422_v55, %v1227_v17 }
 0x19a   :  { %v1460_v8 = vmax.f32 %v768_v7, 0.0  ;;  %821 = vrot.lane.b32.xlu1 %v1456_v63, %s1084_s11 }
 0x19c   :  { %823 = vrot.lane.b32.xlu0 %v1460_v8, %s1084_s11 }
 0x19e   :  { %829 = vrot.lane.b32.xlu1 %v1456_v63, %s1083_s0 }
 0x1a0   :  { %831 = vrot.lane.b32.xlu0 %v1460_v8, %s1083_s0 }
 0x1a2   :  { %805 = vrot.lane.b32.xlu1 %v1456_v63, %s1085_s12 }
 0x1a4   :  { %807 = vrot.lane.b32.xlu0 %v1460_v8, %s1085_s12 }
 0x1a6   :  { %813 = vrot.lane.b32.xlu1 %v1456_v63, %s1086_s5 }
 0x1a8   :  { %815 = vrot.lane.b32.xlu0 %v1460_v8, %s1086_s5 }
 0x1aa   :  { %795 = vrot.lane.b32.xlu1 %v1456_v63, %s1087_s13 }
 0x1ac   :  { %797 = vrot.lane.b32.xlu0 %v1460_v8, %s1087_s13 }
 0x1ae   :  { %779 = vrot.lane.b32.xlu1 %v1456_v63, %s1082_s8 }
 0x1b0   :  { %781 = vrot.lane.b32.xlu0 %v1460_v8, %s1082_s8 }
 0x1b2   :  { %787 = vrot.lane.b32.xlu1 %v1456_v63, %s1089_s14 }
 0x1b4   :  { %789 = vrot.lane.b32.xlu0 %v1460_v8, %s1089_s14 }
 0x1b6   :  { %771 = vrot.lane.b32.xlu1 %v1456_v63, %s1090_s15 }
 0x1b8   :  { %773 = vrot.lane.b32.xlu0 %v1460_v8, %s1090_s15 }
 0x1ba   :  { %565 = vperm.xlu1 %1007, %v55_v9  }
 0x1bc   :  { %571 = vperm.xlu0 %1008, %v55_v9  }
 0x1ec   :  { %v436_v10 = vpop.permute.xlu1 %435 }
 0x1ee   :  { %v438_v14 = vpop.permute.xlu0 %437 }
 0x1ef   :  { %v439_v23 = vsel %vm217_vm3, %v436_v10, %v438_v14  ;;  %v440_v36 = vsel %vm217_vm3, %v438_v14, %v436_v10 }
 0x1f0   :  { %v444_v15 = vpop.permute.xlu1 %443  ;;  %v441_v41 = vmul.f32 %v439_v23, %v1254_v31  ;;  %v442_v44 = vmul.f32 %v440_v36, %v1257_v32 }
 0x1f2   :  { %v446_v16 = vpop.permute.xlu0 %445  ;;  %v471_v49 = vrot.slane %v441_v41, 4  ;;  %v472_v13 = vrot.slane %v442_v44, 4 }
 0x1f3   :  { %v447_v20 = vsel %vm237_vm0, %v444_v15, %v446_v16  ;;  %v448_v22 = vsel %vm237_vm0, %v446_v16, %v444_v15 }
 0x1f4   :  { %v449_v26 = vmul.f32 %v447_v20, %v1234_v19  ;;  %v420_v33 = vpop.permute.xlu1 %419  ;;  %v450_v35 = vmul.f32 %v448_v22, %v1237_v21 }
 0x1f6   :  { %979 = vmatprep.subr.msk.mxu1 %vm280_vm2, %v450_v35  ;;  %v422_v38 = vpop.permute.xlu0 %421 }
 0x1f7   :  { %v423_v42 = vsel %vm177_vm1, %v420_v33, %v422_v38  ;;  %v424_v43 = vsel %vm177_vm1, %v422_v38, %v420_v33  ;;  %980 = vmatpush1.msk.msra.mxu1 %vm280_vm2, %v449_v26 }
 0x1f8   :  { %v426_v45 = vmul.f32 %v424_v43, %v1249_v28  ;;  %v428_v47 = vpop.permute.xlu1 %427  ;;  %v425_v48 = vmul.f32 %v423_v42, %v1261_v34 }
 0x1fa   :  { %v430_v12 = vpop.permute.xlu0 %429  ;;  %v466_v51 = vrot.slane %v426_v45, 4  ;;  %v465_v56 = vrot.slane %v425_v48, 4 }
 0x1fb   :  { %v431_v25 = vsel %vm197_vm4, %v428_v47, %v430_v12  ;;  %v432_v50 = vsel %vm197_vm4, %v430_v12, %v428_v47 }
 0x1fc   :  { %v433_v52 = vmul.f32 %v431_v25, %v1266_v37  ;;  %v434_v53 = vmul.f32 %v432_v50, %v1283_v46  ;;  %v410_v54 = vpop.permute.xlu1 %409  ;;  %v480_v14 = vsel %vm280_vm2, %v418_v60, %v466_v51  ;;  %v479_v15 = vsel %vm280_vm2, %v417_v61, %v465_v56 }
 0x1fe   :  { %v412_v62 = vpop.permute.xlu0 %411  ;;  %v482_v58 = vsel %vm280_vm2, %v434_v53, %v472_v13  ;;  %v481_v59 = vsel %vm280_vm2, %v433_v52, %v471_v49 }
 0x1ff   :  { %516 = vmatprep.subr.mxu1 %v482_v58  ;;  %v413_v7 = vsel %vm143_vm5, %v410_v54, %v412_v62  ;;  %v414_v9 = vsel %vm143_vm5, %v412_v62, %v410_v54  ;;  %v1562_v58 = vld [vmem:[%s1643_s2] sm:$0xf]  ;;  %s1093_s2 = smov [#allocation7]  }
 0x200   :  { %v394_v10 = vpop.permute.xlu1 %393  ;;  %517 = vmatpush1.msra.mxu1 %v481_v59  ;;  %v415_v57 = vmul.f32 %v414_v9, %v1296_v5  ;;  %v416_v20 = vmul.f32 %v413_v7, %v1299_v6  ;;  %s963_s21 = sshll.u32 %s1093_s2, 4  ;;  %s964_s21 = int_to_ptr.vmem [resolvable:$true] %s963_s21 }
 0x201   :  { %518 = vmatprep.subr.mxu1 %v480_v14  ;;  %s1051_s22 = scalar_lea.vmem %s964_s21, 256  ;;  %p1056_p11 = scmp.lt.s32.totalorder %s964_s21, %s964_s21 }
 0x202   :  { %v396_v16 = vpop.permute.xlu0 %395  ;;  %519 = vmatpush1.msra.mxu1 %v479_v15  ;;  %v459_v33 = vrot.slane %v415_v57, 4  ;;  %v460_v35 = vrot.slane %v416_v20, 4  ;;  %p1052_p10 = scmp.ne.s32.totalorder %s964_s21, %s1051_s22  ;;  %p1057_p12 = scmp.lt.s32.totalorder %s1051_s22, %s1051_s22 }
 0x203   :  { %v397_v22 = vsel %vm103_vm6, %v394_v10, %v396_v16  ;;  %v398_v23 = vsel %vm103_vm6, %v396_v16, %v394_v10 }
 0x204   :  { %v402_v55 = vpop.permute.xlu1 %401  ;;  %v399_v41 = vmul.f32 %v398_v23, %v1311_v24  ;;  %v400_v42 = vmul.f32 %v397_v22, %v1314_v27  ;;  %p1058_p13 = por %p1057_p12, %p1056_p11 }
 0x206   :  { %v404_v26 = vpop.permute.xlu0 %403  ;;  %v453_v50 = vrot.slane %v399_v41, 4  ;;  %v454_v13 = vrot.slane %v400_v42, 4  ;;  %p1059_p0 = pnand %p1058_p13, %p1052_p10 }
 0x207   :  { %v405_v36 = vsel %vm123_vm7, %v402_v55, %v404_v26  ;;  %v406_v38 = vsel %vm123_vm7, %v404_v26, %v402_v55 }
 0x208   :  { %v407_v43 = vmul.f32 %v406_v38, %v1318_v29  ;;  %v408_v44 = vmul.f32 %v405_v36, %v1321_v30  ;;  %v386_v45 = vpop.permute.xlu1 %385 }
 0x20a   :  { %v388_v47 = vpop.permute.xlu0 %387  ;;  %v478_v48 = vsel %vm280_vm2, %v408_v44, %v460_v35  ;;  %v477_v12 = vsel %vm280_vm2, %v407_v43, %v459_v33 }
 0x20b   :  { %v389_v49 = vsel %vm83_vm8, %v386_v45, %v388_v47  ;;  %v390_v25 = vsel %vm83_vm8, %v388_v47, %v386_v45  ;;  %520 = vmatprep.subr.mxu1 %v478_v48  ;;  %v804_v45 = vmul.f32 %v1460_v8, %v1230_v18  ;;  %v803_v47 = vmul.f32 %v1456_v63, %v1227_v17 }
 0x20c   :  { %v391_v51 = vmul.f32 %v390_v25, %v1329_v39  ;;  %v392_v52 = vmul.f32 %v389_v49, %v1332_v40  ;;  %v822_v53 = vpop.permute.xlu1 %821  ;;  %521 = vmatpush1.msra.mxu1 %v477_v12 }
 0x20e   :  { %v824_v54 = vpop.permute.xlu0 %823  ;;  %v476_v56 = vsel %vm280_vm2, %v392_v52, %v454_v13  ;;  %v475_v62 = vsel %vm280_vm2, %v391_v51, %v453_v50 }
 0x20f   :  { %522 = vmatprep.subr.mxu1 %v476_v56  ;;  %v825_v9 = vsel %vm217_vm3, %v822_v53, %v824_v54  ;;  %v826_v16 = vsel %vm217_vm3, %v824_v54, %v822_v53 }
 0x210   :  { %v830_v59 = vpop.permute.xlu1 %829  ;;  %523 = vmatpush1.msra.mxu1 %v475_v62 }
 0x211   :  { %981 = vmatmul.mubr.msk.f32.vlgmr.msra.gmra.mxu1 %vm289_vm9, %v1562_v58 }
 0x212   :  { %v832_v60 = vpop.permute.xlu0 %831  ;;  %939 = vmatprep.mubr.f32.mxu1 %v1088_v2  ;;  %v827_v2 = vmul.f32 %v825_v9, %v1254_v31 }
 0x213   :  { %v833_v61 = vsel %vm237_vm0, %v830_v59, %v832_v60  ;;  %v834_v7 = vsel %vm237_vm0, %v832_v60, %v830_v59 }
 0x214   :  { %v835_v10 = vmul.f32 %v833_v61, %v1234_v19  ;;  %v836_v14 = vmul.f32 %v834_v7, %v1237_v21  ;;  %v806_v15 = vpop.permute.xlu1 %805  ;;  %v828_v19 = vmul.f32 %v826_v16, %v1257_v32  ;;  %v857_v33 = vrot.slane %v827_v2, 4 }
 0x216   :  { %v808_v57 = vpop.permute.xlu0 %807  ;;  %985 = vmatprep.subr.msk.mxu1 %vm280_vm2, %v836_v14  ;;  %v858_v36 = vrot.slane %v828_v19, 4 }
 0x217   :  { %v809_v20 = vsel %vm177_vm1, %v806_v15, %v808_v57  ;;  %v810_v55 = vsel %vm177_vm1, %v808_v57, %v806_v15  ;;  %986 = vmatpush1.msk.msra.mxu1 %vm280_vm2, %v835_v10 }
 0x218   :  { %v812_v21 = vmul.f32 %v810_v55, %v1249_v28  ;;  %v814_v22 = vpop.permute.xlu1 %813  ;;  %v811_v23 = vmul.f32 %v809_v20, %v1261_v34 }
 0x21a   :  { %v816_v26 = vpop.permute.xlu0 %815  ;;  %v852_v38 = vrot.slane %v812_v21, 4  ;;  %v851_v43 = vrot.slane %v811_v23, 4 }
 0x21b   :  { %v817_v31 = vsel %vm197_vm4, %v814_v22, %v816_v26  ;;  %v818_v35 = vsel %vm197_vm4, %v816_v26, %v814_v22 }
 0x21c   :  { %v819_v41 = vmul.f32 %v817_v31, %v1266_v37  ;;  %v820_v42 = vmul.f32 %v818_v35, %v1283_v46  ;;  %v796_v32 = vpop.permute.xlu1 %795  ;;  %v866_v12 = vsel %vm280_vm2, %v804_v45, %v852_v38  ;;  %v865_v49 = vsel %vm280_vm2, %v803_v47, %v851_v43 }
 0x21e   :  { %v798_v28 = vpop.permute.xlu0 %797  ;;  %v868_v44 = vsel %vm280_vm2, %v820_v42, %v858_v36  ;;  %v867_v34 = vsel %vm280_vm2, %v819_v41, %v857_v33 }
 0x21f   :  { %899 = vmatprep.subr.mxu1 %v868_v44  ;;  %v799_v48 = vsel %vm143_vm5, %v796_v32, %v798_v28  ;;  %v800_v37 = vsel %vm143_vm5, %v798_v28, %v796_v32 }
 0x220   :  { %v780_v46 = vpop.permute.xlu1 %779  ;;  %900 = vmatpush1.msra.mxu1 %v867_v34  ;;  %v801_v18 = vmul.f32 %v800_v37, %v1296_v5  ;;  %v802_v8 = vmul.f32 %v799_v48, %v1299_v6 }
 0x221   :  { %901 = vmatprep.subr.mxu1 %v866_v12 }
 0x222   :  { %v782_v25 = vpop.permute.xlu0 %781  ;;  %902 = vmatpush1.msra.mxu1 %v865_v49  ;;  %v845_v51 = vrot.slane %v801_v18, 4  ;;  %v846_v52 = vrot.slane %v802_v8, 4 }
 0x223   :  { %v783_v63 = vsel %vm103_vm6, %v780_v46, %v782_v25  ;;  %v784_v50 = vsel %vm103_vm6, %v782_v25, %v780_v46 }
 0x224   :  { %v788_v17 = vpop.permute.xlu1 %787  ;;  %v785_v5 = vmul.f32 %v784_v50, %v1311_v24  ;;  %v786_v6 = vmul.f32 %v783_v63, %v1314_v27 }
 0x226   :  { %v790_v13 = vpop.permute.xlu0 %789  ;;  %v839_v24 = vrot.slane %v785_v5, 4  ;;  %v840_v14 = vrot.slane %v786_v6, 4 }
 0x227   :  { %v791_v53 = vsel %vm123_vm7, %v788_v17, %v790_v13  ;;  %v792_v54 = vsel %vm123_vm7, %v790_v13, %v788_v17 }
 0x228   :  { %v793_v56 = vmul.f32 %v792_v54, %v1318_v29  ;;  %v794_v62 = vmul.f32 %v791_v53, %v1321_v30  ;;  %v772_v59 = vpop.permute.xlu1 %771 }
 0x22a   :  { %v774_v60 = vpop.permute.xlu0 %773  ;;  %v864_v61 = vsel %vm280_vm2, %v794_v62, %v846_v52  ;;  %v863_v7 = vsel %vm280_vm2, %v793_v56, %v845_v51 }
 0x22b   :  { %v775_v9 = vsel %vm83_vm8, %v772_v59, %v774_v60  ;;  %v776_v10 = vsel %vm83_vm8, %v774_v60, %v772_v59  ;;  %903 = vmatprep.subr.mxu1 %v864_v61 }
 0x22c   :  { %v777_v27 = vmul.f32 %v776_v10, %v1329_v39  ;;  %v778_v29 = vmul.f32 %v775_v9, %v1332_v40  ;;  %904 = vmatpush1.msra.mxu1 %v863_v7 }
 0x22e   :  { %v862_v30 = vsel %vm280_vm2, %v778_v29, %v840_v14  ;;  %v861_v15 = vsel %vm280_vm2, %v777_v27, %v839_v24 }
 0x22f   :  { %905 = vmatprep.subr.mxu1 %v862_v30 }
 0x230   :  { %906 = vmatpush1.msra.mxu1 %v861_v15 }
 0x231   :  { %987 = vmatmul.mubr.msk.f32.vlgmr.msra.gmra.mxu1 %vm289_vm9, %v1562_v58 }
 0x235   :  { %v566_v16 = vpop.permute.xlu1 %565 }
 0x237   :  { %v572_v57 = vpop.permute.xlu0 %571 }
 0x2d1   :  { %v558_v11 = vpop.f32.mrf.mxu1 }
 0x2d2   :  { %v568_v2 = vmul.f32 %v566_v16, %v558_v11 }
 0x2d3   :  { %v560_v20 = vpop.f32.mrf.mxu1 }
 0x2d4   :  { %v569_v55 = vmul.f32 %v566_v16, %v560_v20  ;;  %v574_v19 = vadd.f32 %v572_v57, %v568_v2 }
 0x2d6   :  { %v575_v39 = vadd.f32 %v572_v57, %v569_v55  ;;  %v576_v40 = vadd.f32 %v574_v19, %v1139_v0 }
 0x2d8   :  { %v577_v21 = vadd.f32 %v575_v39, %v1147_v1 }
 0x2da   :  { %v580_v22 = vcombine.low %v576_v40, %v577_v21 }
 0x2dc   :  { %582 = vst [vmem:[#allocation7] sm:$0xff] %v580_v22 }
 0x2f1   :  { %v941_v23 = vpop.f32.mrf.mxu1 }
 0x2f2   :  { %v946_v26 = vmul.f32 %v941_v23, %v566_v16 }
 0x2f3   :  { %v943_v33 = vpop.f32.mrf.mxu1 }
 0x2f4   :  { %v948_v31 = vadd.f32 %v946_v26, %v572_v57  ;;  %v947_v35 = vmul.f32 %v943_v33, %v566_v16 }
 0x2f6   :  { %v949_v58 = vadd.f32 %v947_v35, %v572_v57  ;;  %v950_v36 = vadd.f32 %v948_v31, %v1175_v3 }
 0x2f8   :  { %v951_v38 = vadd.f32 %v949_v58, %v1183_v4 }
 0x2fa   :  { %v954_v41 = vcombine.low %v950_v36, %v951_v38 }
 0x2fc   :  { %957 = vst [vmem:[#allocation7 + $0x8] sm:$0xff] %v954_v41 }
 0x2fd   :  { %1062 = shalt.err (!%p1059_p0)
}
 0x2fe   :  { %969 = dma.vmem_to_hbm [thread:$0]  %s964_s21, 256, %s1647_s6, [#allocation4], %s1078_s24, %s1078_s24, %s1079_s25  }
 0x2ff   :  { %1075 = dma.done.wait [#allocation4], 256  }
 0x300   :  { %1076 = vsyncadd [#allocation4], 4294967040 }
 0x301   :  { %973 = vsyncpa [#allocation3], 1 }
 0x302   :  { %974 = vsyncpa [#allocation6], 1 }
 0x303   :  { %975 = vsyncpa [#allocation4], 1 }

</bundles_post_ra>
